<compile_context>
chip_gen: v7x
topology: tpu7x:2x2x1
jax: 0.10.0
libtpu: 0.0.40
codegen_flags: <defaults>
</compile_context>

<pallas_src>
import jax
import jax.numpy as jnp
from jax.experimental import pallas as pl
from jax.experimental.pallas import tpu as pltpu


# -----------------------------------------------------------------------------
# Helpers
# -----------------------------------------------------------------------------
def _round_up(n, m):
    return ((n + m - 1) // m) * m


def _pad2(x, rows, cols):
    return jnp.pad(x, ((0, rows - x.shape[0]), (0, cols - x.shape[1])))


# -----------------------------------------------------------------------------
# Fused Pallas kernel: [SAGE layer]*L + decoder Linear, single grid point.
# -----------------------------------------------------------------------------
def _make_fused_kernel(num_sage_layers):
    def kernel(*refs):
        # refs = [a, deg, x, (w_cat, b)*num_sage_layers, w_dec, b_dec, out]
        a_ref, deg_ref, x_ref = refs[0], refs[1], refs[2]
        wb_refs = refs[3:3 + 2 * num_sage_layers]
        wd_ref = refs[3 + 2 * num_sage_layers]
        bd_ref = refs[4 + 2 * num_sage_layers]
        o_ref = refs[5 + 2 * num_sage_layers]

        a = a_ref[...]                      # [Np, Np] bf16, unnormalized A[dst, src]
        deg = deg_ref[...]                  # [Np, 1]  f32 in-degree (with multiplicity)
        inv_deg = jnp.where(
            deg > 0.0, pl.reciprocal(jnp.maximum(deg, 1.0), approx=True), 0.0)

        h = x_ref[...]                      # bf16 activations
        for layer in range(num_sage_layers):
            w_ref = wb_refs[2 * layer]      # [F_in_p, 2*F_out_p] = [W_l | W_r] (bf16)
            b_ref = wb_refs[2 * layer + 1]  # [1, F_out_p] f32
            f_out = b_ref.shape[1]
            # One MXU pass for both the neighbor and root weight matmuls.
            hw = jnp.dot(h, w_ref[...], preferred_element_type=jnp.float32)
            h_l = hw[:, :f_out].astype(jnp.bfloat16)   # neighbor branch (pre-agg)
            h_r = hw[:, f_out:]                        # root branch (f32)
            # Mean aggregation, reassociated: (1/deg) * (A @ (X @ W_l)).
            agg = jnp.dot(a, h_l, preferred_element_type=jnp.float32) * inv_deg
            out = agg + h_r + b_ref[...]
            if layer < num_sage_layers - 1:            # relu only BETWEEN conv layers
                out = jnp.maximum(out, 0.0)
            h = out.astype(jnp.bfloat16)

        logits = jnp.dot(h, wd_ref[...], preferred_element_type=jnp.float32) + bd_ref[...]
        o_ref[...] = logits.astype(o_ref.dtype)

    return kernel


# -----------------------------------------------------------------------------
# Full model forward (one pallas_call; adjacency/degree built in plain JAX glue)
# -----------------------------------------------------------------------------
def graphsage_nc_forward(params, x, edge_index, *, two_layers):
    n, f_in = x.shape
    num_classes = params["dec_w"].shape[1]

    n_p = _round_up(n, 16)         # bf16 sublane packing
    f_in_p = _round_up(f_in, 128)  # lane-dense features

    # Dense adjacency with edge multiplicity A[dst, src] + in-degree (XLA glue).
    src, dst = edge_index[0], edge_index[1]
    a = jnp.zeros((n_p, n_p), jnp.float32).at[dst, src].add(1.0)
    deg = jnp.sum(a, axis=1, keepdims=True)            # [n_p, 1] f32
    a = a.astype(jnp.bfloat16)
    x_p = _pad2(x, n_p, f_in_p).astype(jnp.bfloat16)

    if two_layers:
        layer_keys = [("c1b_wl", "c1b_wr", "c1b_bl"),
                      ("c2b_wl", "c2b_wr", "c2b_bl")]
    else:
        layer_keys = [("c1_wl", "c1_wr", "c1_bl"),
                      ("c2_wl", "c2_wr", "c2_bl"),
                      ("c3_wl", "c3_wr", "c3_bl")]

    operands = [a, deg, x_p]
    f_prev = f_in_p
    for kl, kr, kb in layer_keys:
        wl, wr, bl = params[kl], params[kr], params[kb]
        f_out_p = _round_up(wl.shape[1], 128)
        w_cat = jnp.concatenate(
            [_pad2(wl, f_prev, f_out_p), _pad2(wr, f_prev, f_out_p)],
            axis=1).astype(jnp.bfloat16)                # [F_in_p, 2*F_out_p]
        operands += [w_cat, _pad2(bl, 1, f_out_p)]      # bias stays f32
        f_prev = f_out_p

    c_p = _round_up(num_classes, 128)
    operands += [_pad2(params["dec_w"], f_prev, c_p).astype(jnp.bfloat16),
                 _pad2(params["dec_b"], 1, c_p)]

    kernel = _make_fused_kernel(len(layer_keys))
    out_p = pl.pallas_call(
        kernel,
        out_shape=jax.ShapeDtypeStruct((n_p, c_p), jnp.float32),
        grid=(1,),
        in_specs=[pl.BlockSpec(op.shape, lambda i: (0, 0)) for op in operands],
        out_specs=pl.BlockSpec((n_p, c_p), lambda i: (0, 0)),
        compiler_params=pltpu.CompilerParams(dimension_semantics=("arbitrary",)),
    )(*operands)
    return out_p[:n, :num_classes]


# -----------------------------------------------------------------------------
# Deterministic parameter construction (logical, unpadded shapes)
# -----------------------------------------------------------------------------
def _lin_params(key, f_in, f_out, bias):
    kw, kb = jax.random.split(key)
    bound = 1.0 / jnp.sqrt(jnp.float32(f_in))
    w = jax.random.uniform(kw, (f_in, f_out), jnp.float32, -bound, bound)
    b = (jax.random.uniform(kb, (1, f_out), jnp.float32, -bound, bound)
         if bias else jnp.zeros((1, f_out), jnp.float32))
    return w, b


def init_params(key, in_feats, hidden, embedding, num_classes):
    keys = jax.random.split(key, 12)
    p = {}
    # conv1/conv2/conv3 (two_layers=False path)
    p["c1_wl"], p["c1_bl"] = _lin_params(keys[0], in_feats, hidden, True)
    p["c1_wr"], _ = _lin_params(keys[1], in_feats, hidden, False)
    p["c2_wl"], p["c2_bl"] = _lin_params(keys[2], hidden, 48, True)
    p["c2_wr"], _ = _lin_params(keys[3], hidden, 48, False)
    p["c3_wl"], p["c3_bl"] = _lin_params(keys[4], 48, embedding, True)
    p["c3_wr"], _ = _lin_params(keys[5], 48, embedding, False)
    # conv1b/conv2b (two_layers=True path)
    p["c1b_wl"], p["c1b_bl"] = _lin_params(keys[6], in_feats, hidden, True)
    p["c1b_wr"], _ = _lin_params(keys[7], in_feats, hidden, False)
    p["c2b_wl"], p["c2b_bl"] = _lin_params(keys[8], hidden, embedding, True)
    p["c2b_wr"], _ = _lin_params(keys[9], hidden, embedding, False)
    # decoder Linear(embedding, num_classes)
    p["dec_w"], p["dec_b"] = _lin_params(keys[10], embedding, num_classes, True)
    return p


if __name__ == "__main__":
    # Small, deterministic problem: 16 nodes, 16 input feats,
    # hidden=32, embedding=16, num_classes=8, 48 random edges.
    N, IN_FEATS, HIDDEN, EMB, NUM_CLASSES, E = 16, 16, 32, 16, 8, 48
    TWO_LAYERS = False

    key = jax.random.PRNGKey(0)
    k_x, k_e, k_p = jax.random.split(key, 3)

    x = jax.random.normal(k_x, (N, IN_FEATS), jnp.float32)
    edge_index = jax.random.randint(k_e, (2, E), 0, N, jnp.int32)
    params = init_params(k_p, IN_FEATS, HIDDEN, EMB, NUM_CLASSES)

    out = graphsage_nc_forward(params, x, edge_index, two_layers=TWO_LAYERS)
    out = jax.block_until_ready(out)
    assert out.shape == (N, NUM_CLASSES)
    print("KERNEL_OK")
</pallas_src>

<mosaic_0001>
module attributes {stable_mosaic.version = 11 : i64} {
  func.func @kernel(%arg0: i32, %arg1: memref<16x16xbf16, #tpu.memory_space<vmem>>, %arg2: memref<16x1xf32, #tpu.memory_space<vmem>>, %arg3: memref<16x128xbf16, #tpu.memory_space<vmem>>, %arg4: memref<128x256xbf16, #tpu.memory_space<vmem>>, %arg5: memref<1x128xf32, #tpu.memory_space<vmem>>, %arg6: memref<128x256xbf16, #tpu.memory_space<vmem>>, %arg7: memref<1x128xf32, #tpu.memory_space<vmem>>, %arg8: memref<128x256xbf16, #tpu.memory_space<vmem>>, %arg9: memref<1x128xf32, #tpu.memory_space<vmem>>, %arg10: memref<128x128xbf16, #tpu.memory_space<vmem>>, %arg11: memref<1x128xf32, #tpu.memory_space<vmem>>, %arg12: memref<16x128xf32, #tpu.memory_space<vmem>>) attributes {dimension_semantics = [#tpu.dimension_semantics<arbitrary>], iteration_bounds = array<i64: 1>, scalar_prefetch = 0 : i64, scratch_operands = 0 : i64, tpu.core_type = #tpu.core_type<tc>, window_params = [{pipeline_mode = #tpu.pipeline_mode<synchronous>, transform_indices = @transform_0, window_bounds = array<i64: 16, 16>}, {pipeline_mode = #tpu.pipeline_mode<synchronous>, transform_indices = @transform_1, window_bounds = array<i64: 16, 1>}, {pipeline_mode = #tpu.pipeline_mode<synchronous>, transform_indices = @transform_2, window_bounds = array<i64: 16, 128>}, {pipeline_mode = #tpu.pipeline_mode<synchronous>, transform_indices = @transform_3, window_bounds = array<i64: 128, 256>}, {pipeline_mode = #tpu.pipeline_mode<synchronous>, transform_indices = @transform_4, window_bounds = array<i64: 1, 128>}, {pipeline_mode = #tpu.pipeline_mode<synchronous>, transform_indices = @transform_5, window_bounds = array<i64: 128, 256>}, {pipeline_mode = #tpu.pipeline_mode<synchronous>, transform_indices = @transform_6, window_bounds = array<i64: 1, 128>}, {pipeline_mode = #tpu.pipeline_mode<synchronous>, transform_indices = @transform_7, window_bounds = array<i64: 128, 256>}, {pipeline_mode = #tpu.pipeline_mode<synchronous>, transform_indices = @transform_8, window_bounds = array<i64: 1, 128>}, {pipeline_mode = #tpu.pipeline_mode<synchronous>, transform_indices = @transform_9, window_bounds = array<i64: 128, 128>}, {pipeline_mode = #tpu.pipeline_mode<synchronous>, transform_indices = @transform_10, window_bounds = array<i64: 1, 128>}, {pipeline_mode = #tpu.pipeline_mode<synchronous>, transform_indices = @transform_11, window_bounds = array<i64: 16, 128>}]} {
    %c0 = arith.constant 0 : index
    %c0_0 = arith.constant 0 : index
    %0 = vector.load %arg1[%c0, %c0_0] : memref<16x16xbf16, #tpu.memory_space<vmem>>, vector<16x16xbf16>
    %c0_1 = arith.constant 0 : index
    %c0_2 = arith.constant 0 : index
    %1 = vector.load %arg2[%c0_1, %c0_2] : memref<16x1xf32, #tpu.memory_space<vmem>>, vector<16x1xf32>
    %cst = arith.constant 0.000000e+00 : f32
    %2 = vector.broadcast %cst : f32 to vector<16x1xf32>
    %3 = arith.cmpf ogt, %1, %2 : vector<16x1xf32>
    %cst_3 = arith.constant 1.000000e+00 : f32
    %4 = vector.broadcast %cst_3 : f32 to vector<16x1xf32>
    %5 = arith.maximumf %1, %4 : vector<16x1xf32>
    %6 = tpu.reciprocal %5 {approx = true} : vector<16x1xf32> -> vector<16x1xf32>
    %cst_4 = arith.constant 0.000000e+00 : f32
    %7 = vector.broadcast %cst_4 : f32 to vector<16x1xf32>
    %8 = arith.select %3, %6, %7 : vector<16x1xi1>, vector<16x1xf32>
    %c0_5 = arith.constant 0 : index
    %c0_6 = arith.constant 0 : index
    %9 = vector.load %arg3[%c0_5, %c0_6] : memref<16x128xbf16, #tpu.memory_space<vmem>>, vector<16x128xbf16>
    %c0_7 = arith.constant 0 : index
    %c0_8 = arith.constant 0 : index
    %10 = vector.load %arg4[%c0_7, %c0_8] : memref<128x256xbf16, #tpu.memory_space<vmem>>, vector<128x256xbf16>
    %cst_9 = arith.constant dense<0.000000e+00> : vector<16x256xf32>
    %11 = tpu.matmul %9, %10, %cst_9 {dimension_numbers = #tpu.dot_dimension_numbers<[1], [0], [0], [1], [0, 0, 1, 1], [], []>} : vector<16x128xbf16>, vector<128x256xbf16>, vector<16x256xf32> -> vector<16x256xf32>
    %12 = vector.extract_strided_slice %11 {offsets = [0, 0], sizes = [16, 128], strides = [1, 1]} : vector<16x256xf32> to vector<16x128xf32>
    %13 = arith.truncf %12 : vector<16x128xf32> to vector<16x128xbf16>
    %14 = vector.extract_strided_slice %11 {offsets = [0, 128], sizes = [16, 128], strides = [1, 1]} : vector<16x256xf32> to vector<16x128xf32>
    %cst_10 = arith.constant dense<0.000000e+00> : vector<16x128xf32>
    %15 = tpu.matmul %0, %13, %cst_10 {dimension_numbers = #tpu.dot_dimension_numbers<[1], [0], [0], [1], [0, 0, 1, 1], [], []>} : vector<16x16xbf16>, vector<16x128xbf16>, vector<16x128xf32> -> vector<16x128xf32>
    %16 = vector.broadcast %8 : vector<16x1xf32> to vector<16x128xf32>
    %17 = arith.mulf %15, %16 : vector<16x128xf32>
    %18 = arith.addf %17, %14 : vector<16x128xf32>
    %c0_11 = arith.constant 0 : index
    %c0_12 = arith.constant 0 : index
    %19 = vector.load %arg5[%c0_11, %c0_12] : memref<1x128xf32, #tpu.memory_space<vmem>>, vector<1x128xf32>
    %20 = vector.broadcast %19 : vector<1x128xf32> to vector<16x128xf32>
    %21 = arith.addf %18, %20 : vector<16x128xf32>
    %cst_13 = arith.constant 0.000000e+00 : f32
    %22 = vector.broadcast %cst_13 : f32 to vector<16x128xf32>
    %23 = arith.maximumf %21, %22 : vector<16x128xf32>
    %24 = arith.truncf %23 : vector<16x128xf32> to vector<16x128xbf16>
    %c0_14 = arith.constant 0 : index
    %c0_15 = arith.constant 0 : index
    %25 = vector.load %arg6[%c0_14, %c0_15] : memref<128x256xbf16, #tpu.memory_space<vmem>>, vector<128x256xbf16>
    %cst_16 = arith.constant dense<0.000000e+00> : vector<16x256xf32>
    %26 = tpu.matmul %24, %25, %cst_16 {dimension_numbers = #tpu.dot_dimension_numbers<[1], [0], [0], [1], [0, 0, 1, 1], [], []>} : vector<16x128xbf16>, vector<128x256xbf16>, vector<16x256xf32> -> vector<16x256xf32>
    %27 = vector.extract_strided_slice %26 {offsets = [0, 0], sizes = [16, 128], strides = [1, 1]} : vector<16x256xf32> to vector<16x128xf32>
    %28 = arith.truncf %27 : vector<16x128xf32> to vector<16x128xbf16>
    %29 = vector.extract_strided_slice %26 {offsets = [0, 128], sizes = [16, 128], strides = [1, 1]} : vector<16x256xf32> to vector<16x128xf32>
    %cst_17 = arith.constant dense<0.000000e+00> : vector<16x128xf32>
    %30 = tpu.matmul %0, %28, %cst_17 {dimension_numbers = #tpu.dot_dimension_numbers<[1], [0], [0], [1], [0, 0, 1, 1], [], []>} : vector<16x16xbf16>, vector<16x128xbf16>, vector<16x128xf32> -> vector<16x128xf32>
    %31 = vector.broadcast %8 : vector<16x1xf32> to vector<16x128xf32>
    %32 = arith.mulf %30, %31 : vector<16x128xf32>
    %33 = arith.addf %32, %29 : vector<16x128xf32>
    %c0_18 = arith.constant 0 : index
    %c0_19 = arith.constant 0 : index
    %34 = vector.load %arg7[%c0_18, %c0_19] : memref<1x128xf32, #tpu.memory_space<vmem>>, vector<1x128xf32>
    %35 = vector.broadcast %34 : vector<1x128xf32> to vector<16x128xf32>
    %36 = arith.addf %33, %35 : vector<16x128xf32>
    %cst_20 = arith.constant 0.000000e+00 : f32
    %37 = vector.broadcast %cst_20 : f32 to vector<16x128xf32>
    %38 = arith.maximumf %36, %37 : vector<16x128xf32>
    %39 = arith.truncf %38 : vector<16x128xf32> to vector<16x128xbf16>
    %c0_21 = arith.constant 0 : index
    %c0_22 = arith.constant 0 : index
    %40 = vector.load %arg8[%c0_21, %c0_22] : memref<128x256xbf16, #tpu.memory_space<vmem>>, vector<128x256xbf16>
    %cst_23 = arith.constant dense<0.000000e+00> : vector<16x256xf32>
    %41 = tpu.matmul %39, %40, %cst_23 {dimension_numbers = #tpu.dot_dimension_numbers<[1], [0], [0], [1], [0, 0, 1, 1], [], []>} : vector<16x128xbf16>, vector<128x256xbf16>, vector<16x256xf32> -> vector<16x256xf32>
    %42 = vector.extract_strided_slice %41 {offsets = [0, 0], sizes = [16, 128], strides = [1, 1]} : vector<16x256xf32> to vector<16x128xf32>
    %43 = arith.truncf %42 : vector<16x128xf32> to vector<16x128xbf16>
    %44 = vector.extract_strided_slice %41 {offsets = [0, 128], sizes = [16, 128], strides = [1, 1]} : vector<16x256xf32> to vector<16x128xf32>
    %cst_24 = arith.constant dense<0.000000e+00> : vector<16x128xf32>
    %45 = tpu.matmul %0, %43, %cst_24 {dimension_numbers = #tpu.dot_dimension_numbers<[1], [0], [0], [1], [0, 0, 1, 1], [], []>} : vector<16x16xbf16>, vector<16x128xbf16>, vector<16x128xf32> -> vector<16x128xf32>
    %46 = vector.broadcast %8 : vector<16x1xf32> to vector<16x128xf32>
    %47 = arith.mulf %45, %46 : vector<16x128xf32>
    %48 = arith.addf %47, %44 : vector<16x128xf32>
    %c0_25 = arith.constant 0 : index
    %c0_26 = arith.constant 0 : index
    %49 = vector.load %arg9[%c0_25, %c0_26] : memref<1x128xf32, #tpu.memory_space<vmem>>, vector<1x128xf32>
    %50 = vector.broadcast %49 : vector<1x128xf32> to vector<16x128xf32>
    %51 = arith.addf %48, %50 : vector<16x128xf32>
    %52 = arith.truncf %51 : vector<16x128xf32> to vector<16x128xbf16>
    %c0_27 = arith.constant 0 : index
    %c0_28 = arith.constant 0 : index
    %53 = vector.load %arg10[%c0_27, %c0_28] : memref<128x128xbf16, #tpu.memory_space<vmem>>, vector<128x128xbf16>
    %cst_29 = arith.constant dense<0.000000e+00> : vector<16x128xf32>
    %54 = tpu.matmul %52, %53, %cst_29 {dimension_numbers = #tpu.dot_dimension_numbers<[1], [0], [0], [1], [0, 0, 1, 1], [], []>} : vector<16x128xbf16>, vector<128x128xbf16>, vector<16x128xf32> -> vector<16x128xf32>
    %c0_30 = arith.constant 0 : index
    %c0_31 = arith.constant 0 : index
    %55 = vector.load %arg11[%c0_30, %c0_31] : memref<1x128xf32, #tpu.memory_space<vmem>>, vector<1x128xf32>
    %56 = vector.broadcast %55 : vector<1x128xf32> to vector<16x128xf32>
    %57 = arith.addf %54, %56 : vector<16x128xf32>
    %c0_32 = arith.constant 0 : index
    %c0_33 = arith.constant 0 : index
    %58 = vector.load %arg12[%c0_32, %c0_33] : memref<16x128xf32, #tpu.memory_space<vmem>>, vector<16x128xf32>
    tpu.vector_store %arg12[%c0_32, %c0_33], %57 {strides = array<i32>} : memref<16x128xf32, #tpu.memory_space<vmem>>, vector<16x128xf32>,
    return
  }
  func.func @transform_0(%arg0: i32) -> (i32, i32) {
    %c0_i32 = arith.constant 0 : i32
    %c0_i32_0 = arith.constant 0 : i32
    %c0_i32_1 = arith.constant 0 : i32
    return %c0_i32, %c0_i32_0 : i32, i32
  }
  func.func @transform_1(%arg0: i32) -> (i32, i32) {
    %c0_i32 = arith.constant 0 : i32
    %c0_i32_0 = arith.constant 0 : i32
    %c0_i32_1 = arith.constant 0 : i32
    return %c0_i32, %c0_i32_0 : i32, i32
  }
  func.func @transform_2(%arg0: i32) -> (i32, i32) {
    %c0_i32 = arith.constant 0 : i32
    %c0_i32_0 = arith.constant 0 : i32
    %c0_i32_1 = arith.constant 0 : i32
    return %c0_i32, %c0_i32_0 : i32, i32
  }
  func.func @transform_3(%arg0: i32) -> (i32, i32) {
    %c0_i32 = arith.constant 0 : i32
    %c0_i32_0 = arith.constant 0 : i32
    %c0_i32_1 = arith.constant 0 : i32
    return %c0_i32, %c0_i32_0 : i32, i32
  }
  func.func @transform_4(%arg0: i32) -> (i32, i32) {
    %c0_i32 = arith.constant 0 : i32
    %c0_i32_0 = arith.constant 0 : i32
    %c0_i32_1 = arith.constant 0 : i32
    return %c0_i32, %c0_i32_0 : i32, i32
  }
  func.func @transform_5(%arg0: i32) -> (i32, i32) {
    %c0_i32 = arith.constant 0 : i32
    %c0_i32_0 = arith.constant 0 : i32
    %c0_i32_1 = arith.constant 0 : i32
    return %c0_i32, %c0_i32_0 : i32, i32
  }
  func.func @transform_6(%arg0: i32) -> (i32, i32) {
    %c0_i32 = arith.constant 0 : i32
    %c0_i32_0 = arith.constant 0 : i32
    %c0_i32_1 = arith.constant 0 : i32
    return %c0_i32, %c0_i32_0 : i32, i32
  }
  func.func @transform_7(%arg0: i32) -> (i32, i32) {
    %c0_i32 = arith.constant 0 : i32
    %c0_i32_0 = arith.constant 0 : i32
    %c0_i32_1 = arith.constant 0 : i32
    return %c0_i32, %c0_i32_0 : i32, i32
  }
  func.func @transform_8(%arg0: i32) -> (i32, i32) {
    %c0_i32 = arith.constant 0 : i32
    %c0_i32_0 = arith.constant 0 : i32
    %c0_i32_1 = arith.constant 0 : i32
    return %c0_i32, %c0_i32_0 : i32, i32
  }
  func.func @transform_9(%arg0: i32) -> (i32, i32) {
    %c0_i32 = arith.constant 0 : i32
    %c0_i32_0 = arith.constant 0 : i32
    %c0_i32_1 = arith.constant 0 : i32
    return %c0_i32, %c0_i32_0 : i32, i32
  }
  func.func @transform_10(%arg0: i32) -> (i32, i32) {
    %c0_i32 = arith.constant 0 : i32
    %c0_i32_0 = arith.constant 0 : i32
    %c0_i32_1 = arith.constant 0 : i32
    return %c0_i32, %c0_i32_0 : i32, i32
  }
  func.func @transform_11(%arg0: i32) -> (i32, i32) {
    %c0_i32 = arith.constant 0 : i32
    %c0_i32_0 = arith.constant 0 : i32
    %c0_i32_1 = arith.constant 0 : i32
    return %c0_i32, %c0_i32_0 : i32, i32
  }
}

</mosaic_0001>

<bundles_post_ra>
// kernel: tpu_custom_call.1
= control target key start
LH: loop header
LB: loop body
LE: loop exit
PB: predicated region body
PF: predicated region fallthrough
CT: control target
= control target key end

     0   :  { %16 = vsyncpa [#allocation3], 0  ;;  %s1414_s0 = inlined_call_operand.vmem [shape: bf16[16,16], index: 0, kind: input, shape index: {}]   ;;  %s1415_s1 = inlined_call_operand.vmem [shape: f32[16,1], index: 1, kind: input, shape index: {}]   ;;  %s1416_s2 = inlined_call_operand.vmem [shape: bf16[16,128], index: 2, kind: input, shape index: {}]   ;;  %s1417_s3 = inlined_call_operand.hbm [shape: bf16[128,256], index: 3, kind: input, shape index: {}]   ;;  %s1418_s4 = inlined_call_operand.vmem [shape: f32[1,128], index: 4, kind: input, shape index: {}]   ;;  %s1419_s5 = inlined_call_operand.hbm [shape: bf16[128,256], index: 5, kind: input, shape index: {}]   ;;  %s1420_s6 = inlined_call_operand.vmem [shape: f32[1,128], index: 6, kind: input, shape index: {}]   ;;  %s1421_s7 = inlined_call_operand.hbm [shape: bf16[128,256], index: 7, kind: input, shape index: {}]   ;;  %s1422_s8 = inlined_call_operand.vmem [shape: f32[1,128], index: 8, kind: input, shape index: {}]   ;;  %s1423_s9 = inlined_call_operand.hbm [shape: bf16[128,128], index: 9, kind: input, shape index: {}]   ;;  %s1424_s10 = inlined_call_operand.vmem [shape: f32[1,128], index: 10, kind: input, shape index: {}]   ;;  %s1425_s11 = inlined_call_operand.hbm [shape: f32[16,128], index: 11, kind: output, shape index: {}]  }
   0x1   :  { %17 = vsyncpa [#allocation6], 0 }
   0x2   :  { %18 = vsyncpa [#allocation9], 0 }
   0x3   :  { %19 = vsyncpa [#allocation4], 0  ;;  %s1191_s17 = smov [#allocation5]   ;;  %s1192_s19 = smov [#allocation2]  }
   0x4   :  { %s45_s18 = sshll.u32 %s1191_s17, 4  ;;  %s31_s20 = sshll.u32 %s1192_s19, 4  ;;  %s46_s18 = int_to_ptr.vmem [resolvable:$true] %s45_s18  ;;  %s1263_s20 = int_to_ptr.vmem [resolvable:$true] %s31_s20 }
   0x5   :  { %s1073_s23 = scalar_lea.hbm %s1419_s5, 2048 }
   0x6   :  { %p1074_p0 = scmp.ne.s32.totalorder %s1419_s5, %s1073_s23  ;;  %p1077_p1 = scmp.lt.u32.totalorder %s1073_s23, %s1419_s5 }
   0x8   :  { %p1079_p2 = pnand %p1077_p1, %p1074_p0 }
   0xa   :  { %1082 = shalt.err (!%p1079_p2)
}
   0xb   :  { %s1083_s28 = scalar_lea.vmem %s46_s18, 2048  ;;  %p1088_p4 = scmp.lt.s32.totalorder %s46_s18, %s46_s18 }
   0xc   :  { %p1084_p3 = scmp.ne.s32.totalorder %s46_s18, %s1083_s28  ;;  %p1089_p5 = scmp.lt.s32.totalorder %s1083_s28, %s1083_s28 }
   0xe   :  { %p1090_p6 = por %p1089_p5, %p1088_p4 }
  0x10   :  { %p1091_p7 = pnand %p1090_p6, %p1084_p3 }
  0x12   :  { %1094 = shalt.err (!%p1091_p7)
}
  0x13   :  { %s1193_s29 = smov 128   ;;  %s1194_s30 = smov 8  }
  0x14   :  { %51 = dma.hbm_to_vmem [thread:$0]  %s1419_s5, 2048, %s46_s18, [#allocation6], %s1193_s29, %s1193_s29, %s1194_s30  }
  0x15   :  { %s1095_s16 = scalar_lea.hbm %s1417_s3, 2048 }
  0x16   :  { %p1096_p8 = scmp.ne.s32.totalorder %s1417_s3, %s1095_s16  ;;  %p1099_p9 = scmp.lt.u32.totalorder %s1095_s16, %s1417_s3 }
  0x18   :  { %p1101_p10 = pnand %p1099_p9, %p1096_p8 }
  0x1a   :  { %1104 = shalt.err (!%p1101_p10)
}
  0x1b   :  { %s1105_s23 = scalar_lea.vmem %s1263_s20, 2048  ;;  %p1110_p12 = scmp.lt.s32.totalorder %s1263_s20, %s1263_s20 }
  0x1c   :  { %p1106_p11 = scmp.ne.s32.totalorder %s1263_s20, %s1105_s23  ;;  %p1111_p13 = scmp.lt.s32.totalorder %s1105_s23, %s1105_s23 }
  0x1e   :  { %p1112_p0 = por %p1111_p13, %p1110_p12 }
  0x20   :  { %p1113_p1 = pnand %p1112_p0, %p1106_p11 }
  0x22   :  { %1116 = shalt.err (!%p1113_p1)
}
  0x23   :  { %37 = dma.hbm_to_vmem [thread:$0]  %s1417_s3, 2048, %s1263_s20, [#allocation3], %s1193_s29, %s1193_s29, %s1194_s30  }
  0x24   :  { %s1195_s24 = smov [#allocation7]   ;;  %s1196_s26 = smov [#allocation8]  }
  0x25   :  { %s59_s25 = sshll.u32 %s1195_s24, 4  ;;  %s73_s27 = sshll.u32 %s1196_s26, 4  ;;  %s60_s25 = int_to_ptr.vmem [resolvable:$true] %s59_s25  ;;  %s1300_s27 = int_to_ptr.vmem [resolvable:$true] %s73_s27 }
  0x26   :  { %s1117_s13 = scalar_lea.hbm %s1421_s7, 2048 }
  0x27   :  { %p1118_p2 = scmp.ne.s32.totalorder %s1421_s7, %s1117_s13  ;;  %p1121_p3 = scmp.lt.u32.totalorder %s1117_s13, %s1421_s7 }
  0x29   :  { %p1123_p4 = pnand %p1121_p3, %p1118_p2 }
  0x2b   :  { %1126 = shalt.err (!%p1123_p4)
}
  0x2c   :  { %s1127_s3 = scalar_lea.vmem %s60_s25, 2048  ;;  %p1132_p6 = scmp.lt.s32.totalorder %s60_s25, %s60_s25 }
  0x2d   :  { %p1128_p5 = scmp.ne.s32.totalorder %s60_s25, %s1127_s3  ;;  %p1133_p7 = scmp.lt.s32.totalorder %s1127_s3, %s1127_s3 }
  0x2f   :  { %p1134_p8 = por %p1133_p7, %p1132_p6 }
  0x31   :  { %p1135_p9 = pnand %p1134_p8, %p1128_p5 }
  0x33   :  { %1138 = shalt.err (!%p1135_p9)
}
  0x34   :  { %65 = dma.hbm_to_vmem [thread:$0]  %s1421_s7, 2048, %s60_s25, [#allocation6], %s1193_s29, %s1193_s29, %s1194_s30  }
  0x35   :  { %s1139_s23 = scalar_lea.hbm %s1423_s9, 1024 }
  0x36   :  { %p1140_p10 = scmp.ne.s32.totalorder %s1423_s9, %s1139_s23  ;;  %p1143_p11 = scmp.lt.u32.totalorder %s1139_s23, %s1423_s9 }
  0x38   :  { %p1145_p12 = pnand %p1143_p11, %p1140_p10 }
  0x3a   :  { %1148 = shalt.err (!%p1145_p12)
}
  0x3b   :  { %s1149_s28 = scalar_lea.vmem %s1300_s27, 1024  ;;  %p1154_p0 = scmp.lt.s32.totalorder %s1300_s27, %s1300_s27 }
  0x3c   :  { %p1150_p13 = scmp.ne.s32.totalorder %s1300_s27, %s1149_s28  ;;  %p1155_p1 = scmp.lt.s32.totalorder %s1149_s28, %s1149_s28 }
  0x3e   :  { %p1156_p2 = por %p1155_p1, %p1154_p0 }
  0x40   :  { %p1157_p3 = pnand %p1156_p2, %p1150_p13 }
  0x42   :  { %1160 = shalt.err (!%p1157_p3)
}
  0x43   :  { %s1197_s7 = smov 64   ;;  %s1198_s25 = smov 4  }
  0x44   :  { %79 = dma.hbm_to_vmem [thread:$0]  %s1423_s9, 1024, %s1300_s27, [#allocation9], %s1197_s7, %s1197_s7, %s1198_s25  }
  0x45   :  { %1183 = dma.done.wait [#allocation3], 2048  }
  0x46   :  { %1184 = vsyncadd [#allocation3], 4294965248 }
  0x47   :  { %1185 = dma.done.wait [#allocation6], 4096  }
  0x48   :  { %1186 = vsyncadd [#allocation6], 4294963200 }
  0x49   :  { %1187 = dma.done.wait [#allocation9], 1024  }
  0x4a   :  { %1188 = vsyncadd [#allocation9], 4294966272  ;;  %v1199_v0 = vmov 0   ;;  %v987_v1 = vld [vmem:[#allocation2 + $0x4] ss:$8 sps:$4 sm:$0xff]   ;;  %v1200_v18 = vmov 0.0  }
  0x4b   :  { %243 = vmatprep.mubr.bf16.mxu0 %v1199_v0  ;;  %986 = vset.pattern.permute.xlu0 %v1199_v0  ;;  %v989_v2 = vld [vmem:[#allocation2] ss:$8 sps:$4 sm:$0xff]   ;;  %v990_v3 = vld [vmem:[#allocation2 + $0x14] ss:$8 sps:$4 sm:$0xff]   ;;  %v992_v4 = vld [vmem:[#allocation2 + $0x10] ss:$8 sps:$4 sm:$0xff]  }
  0x4c   :  { %211 = vmatprep.subr.bf16.mxu0 %v987_v1  ;;  %v993_v5 = vld [vmem:[#allocation2 + $0x24] ss:$8 sps:$4 sm:$0xff]   ;;  %v995_v6 = vld [vmem:[#allocation2 + $0x20] ss:$8 sps:$4 sm:$0xff]   ;;  %v996_v7 = vld [vmem:[#allocation2 + $0x34] ss:$8 sps:$4 sm:$0xff]   ;;  %936 = vmatprep.subr.bf16.mxu1 %v1200_v18 }
  0x4d   :  { %212 = vmatpush1.bf16.msra.mxu0 %v989_v2  ;;  %v998_v8 = vld [vmem:[#allocation2 + $0x30] ss:$8 sps:$4 sm:$0xff]   ;;  %v999_v9 = vld [vmem:[#allocation2 + $0x44] ss:$8 sps:$4 sm:$0xff]   ;;  %v1001_v10 = vld [vmem:[#allocation2 + $0x40] ss:$8 sps:$4 sm:$0xff]  }
  0x4e   :  { %213 = vmatprep.subr.bf16.mxu0 %v990_v3  ;;  %v1002_v11 = vld [vmem:[#allocation2 + $0x54] ss:$8 sps:$4 sm:$0xff]   ;;  %v1004_v12 = vld [vmem:[#allocation2 + $0x50] ss:$8 sps:$4 sm:$0xff]   ;;  %v1005_v13 = vld [vmem:[#allocation2 + $0x64] ss:$8 sps:$4 sm:$0xff]  }
  0x4f   :  { %v1007_v14 = vld [vmem:[#allocation2 + $0x60] ss:$8 sps:$4 sm:$0xff]   ;;  %v1008_v15 = vld [vmem:[#allocation2 + $0x74] ss:$8 sps:$4 sm:$0xff]   ;;  %v1010_v16 = vld [vmem:[#allocation2 + $0x70] ss:$8 sps:$4 sm:$0xff]  }
  0x50   :  { %v1011_v17 = vld [vmem:[%s1416_s2] sm:$0xff]   ;;  %vm1201_vm0 = vmmov 0   ;;  %v98_v20 = vld [vmem:[%s1415_s1 + $0x8] sm:$0xff]  ;;  %vm260_vm3 = vcmask 130048   ;;  %v1018_v35 = vld [vmem:[#allocation5 + $0x14] ss:$8 sps:$4 sm:$0xff]  }
  0x51   :  { %214 = vmatpush1.bf16.msra.mxu0 %v992_v4  ;;  %938 = vmatprep.mubr.msk.bf16.mxu1 %vm1201_vm0, %v1200_v18  ;;  %v97_v19 = vld [vmem:[%s1415_s1] sm:$0xff]  ;;  %v102_v22 = vmax.f32 %v98_v20, 1.0  ;;  %vm100_vm2 = vcmp.gt.f32.partialorder %v98_v20, 0.0  ;;  %v1016_v36 = vld [vmem:[#allocation5 + $0x10] ss:$8 sps:$4 sm:$0xff]   ;;  %s1202_s23 = smov [#allocation10]  }
  0x52   :  { %215 = vmatprep.subr.bf16.mxu0 %v993_v5  ;;  %v101_v21 = vmax.f32 %v97_v19, 1.0  ;;  %vm99_vm1 = vcmp.gt.f32.partialorder %v97_v19, 0.0  ;;  %v1015_v30 = vld [vmem:[#allocation5 + $0x4] ss:$8 sps:$4 sm:$0xff]   ;;  %v1013_v34 = vld [vmem:[#allocation5] ss:$8 sps:$4 sm:$0xff]  }
  0x53   :  { %v1354_v33 = vld [vmem:[%s1414_s0] sm:$0xff]   ;;  %v1024_v39 = vld [vmem:[#allocation5 + $0x34] ss:$8 sps:$4 sm:$0xff]   ;;  %v1022_v40 = vld [vmem:[#allocation5 + $0x30] ss:$8 sps:$4 sm:$0xff]   ;;  %s842_s5 = sshll.u32 %s1202_s23, 4  ;;  %s843_s5 = int_to_ptr.vmem [resolvable:$true] %s842_s5 }
  0x54   :  { %1069 = vrcp.f32 %v101_v21  ;;  %v1021_v37 = vld [vmem:[#allocation5 + $0x24] ss:$8 sps:$4 sm:$0xff]   ;;  %v1019_v38 = vld [vmem:[#allocation5 + $0x20] ss:$8 sps:$4 sm:$0xff]   ;;  %v1030_v43 = vld [vmem:[#allocation5 + $0x54] ss:$8 sps:$4 sm:$0xff]   ;;  %p1166_p5 = scmp.lt.s32.totalorder %s843_s5, %s843_s5 }
  0x55   :  { %216 = vmatpush1.bf16.msra.mxu0 %v995_v6  ;;  %1071 = vrcp.f32 %v102_v22  ;;  %v1027_v41 = vld [vmem:[#allocation5 + $0x44] ss:$8 sps:$4 sm:$0xff]   ;;  %v1025_v42 = vld [vmem:[#allocation5 + $0x40] ss:$8 sps:$4 sm:$0xff]   ;;  %v1028_v44 = vld [vmem:[#allocation5 + $0x50] ss:$8 sps:$4 sm:$0xff]  }
  0x56   :  { %217 = vmatprep.subr.bf16.mxu0 %v996_v7  ;;  %v1033_v45 = vld [vmem:[#allocation5 + $0x64] ss:$8 sps:$4 sm:$0xff]   ;;  %v1031_v46 = vld [vmem:[#allocation5 + $0x60] ss:$8 sps:$4 sm:$0xff]   ;;  %v1036_v47 = vld [vmem:[#allocation5 + $0x74] ss:$8 sps:$4 sm:$0xff]  }
  0x57   :  { %v1034_v48 = vld [vmem:[#allocation5 + $0x70] ss:$8 sps:$4 sm:$0xff]   ;;  %v875_v54 = vld [vmem:[%s1418_s4] ss:$0 sm:$0xff]  ;;  %v1039_v5 = vld [vmem:[#allocation7 + $0x4] ss:$8 sps:$4 sm:$0xff]  }
  0x58   :  { %v1052_v19 = vld [vmem:[#allocation7 + $0x50] ss:$8 sps:$4 sm:$0xff]   ;;  %v1057_v20 = vld [vmem:[#allocation7 + $0x64] ss:$8 sps:$4 sm:$0xff]   ;;  %v1060_v21 = vld [vmem:[#allocation7 + $0x74] ss:$8 sps:$4 sm:$0xff]  }
  0x59   :  { %218 = vmatpush1.bf16.msra.mxu0 %v998_v8  ;;  %v1037_v8 = vld [vmem:[#allocation7] ss:$8 sps:$4 sm:$0xff]   ;;  %v1058_v22 = vld [vmem:[#allocation7 + $0x70] ss:$8 sps:$4 sm:$0xff]  }
  0x5a   :  { %219 = vmatprep.subr.bf16.mxu0 %v999_v9  ;;  %v1042_v9 = vld [vmem:[#allocation7 + $0x14] ss:$8 sps:$4 sm:$0xff]  }
  0x5d   :  { %220 = vmatpush1.bf16.msra.mxu0 %v1001_v10  ;;  %v1040_v10 = vld [vmem:[#allocation7 + $0x10] ss:$8 sps:$4 sm:$0xff]  }
  0x5e   :  { %221 = vmatprep.subr.bf16.mxu0 %v1002_v11  ;;  %v1070_v23 = vpop.eup %1069  ;;  %v1045_v11 = vld [vmem:[#allocation7 + $0x24] ss:$8 sps:$4 sm:$0xff]  }
  0x5f   :  { %v1072_v24 = vpop.eup %1071  ;;  %v105_v25 = vsel %vm99_vm1, %v1070_v23, 0.0 }
  0x60   :  { %307 = vperm.xlu0 %986, %v105_v25   ;;  %v106_v26 = vsel %vm100_vm2, %v1072_v24, 0.0 }
  0x61   :  { %222 = vmatpush1.bf16.msra.mxu0 %v1004_v12  ;;  %v1043_v12 = vld [vmem:[#allocation7 + $0x20] ss:$8 sps:$4 sm:$0xff]  }
  0x62   :  { %223 = vmatprep.subr.bf16.mxu0 %v1005_v13  ;;  %v1048_v13 = vld [vmem:[#allocation7 + $0x34] ss:$8 sps:$4 sm:$0xff]  }
  0x64   :  { %312 = vperm.xlu0 %986, %v106_v26   ;;  %v893_v26 = vld [vmem:[%s1420_s6] ss:$0 sm:$0xff] }
  0x65   :  { %224 = vmatpush1.bf16.msra.mxu0 %v1007_v14  ;;  %v1046_v14 = vld [vmem:[#allocation7 + $0x30] ss:$8 sps:$4 sm:$0xff]  }
  0x66   :  { %225 = vmatprep.subr.bf16.mxu0 %v1008_v15  ;;  %v1051_v15 = vld [vmem:[#allocation7 + $0x44] ss:$8 sps:$4 sm:$0xff]  }
  0x69   :  { %226 = vmatpush1.bf16.msra.mxu0 %v1010_v16  ;;  %v1049_v16 = vld [vmem:[#allocation7 + $0x40] ss:$8 sps:$4 sm:$0xff]  }
  0x6a   :  { %948 = vmatprep.subr.bf16.mxu0 %v1200_v18 }
  0x6c   :  { %244 = vmatmul.mubr.bf16.vlgmr.msra.gmra.mrb[0].mxu0 %v1011_v17  ;;  %v1054_v17 = vld [vmem:[#allocation7 + $0x54] ss:$8 sps:$4 sm:$0xff]  }
  0x6d   :  { %950 = vmatprep.mubr.msk.bf16.mxu0 %vm1201_vm0, %v1200_v18 }
  0xdf   :  { %v1360_v49 = vpop.permute.xlu0 %307 }
  0xe3   :  { %v1363_v53 = vpop.permute.xlu0 %312 }
 0x13f   :  { %v245_v27 = vpop.f32.mrb[0].mxu0 }
 0x140   :  { %v247_v28 = vpop.f32.mrb[1].mxu0 }
 0x141   :  { %v249_v29 = vpop.f32.mrb[2].mxu0 }
 0x142   :  { %v254_v31 = vpack.c.bf16 %v249_v29, %v245_v27  ;;  %v251_v32 = vpop.f32.mrb[3].mxu0 }
 0x144   :  { %937 = vmatpush3.bf16.msra.mxu1 %v254_v31 }
 0x145   :  { %427 = vmatprep.subr.bf16.mxu1 %v1015_v30 }
 0x147   :  { %939 = vmatmul.mubr.msk.bf16.vlgmr.msra.gmra.mrb[0].mxu1 %vm260_vm3, %v1354_v33 }
 0x148   :  { %428 = vmatpush1.bf16.msra.mxu1 %v1013_v34  ;;  %459 = vmatprep.mubr.bf16.mxu1 %v1199_v0 }
 0x149   :  { %429 = vmatprep.subr.bf16.mxu1 %v1018_v35 }
 0x14c   :  { %430 = vmatpush1.bf16.msra.mxu1 %v1016_v36 }
 0x14d   :  { %431 = vmatprep.subr.bf16.mxu1 %v1021_v37 }
 0x150   :  { %432 = vmatpush1.bf16.msra.mxu1 %v1019_v38 }
 0x151   :  { %433 = vmatprep.subr.bf16.mxu1 %v1024_v39 }
 0x154   :  { %434 = vmatpush1.bf16.msra.mxu1 %v1022_v40 }
 0x155   :  { %435 = vmatprep.subr.bf16.mxu1 %v1027_v41 }
 0x158   :  { %436 = vmatpush1.bf16.msra.mxu1 %v1025_v42 }
 0x159   :  { %437 = vmatprep.subr.bf16.mxu1 %v1030_v43  ;;  %v1061_v43 = vld [vmem:[#allocation8] sm:$0xff]  }
 0x15c   :  { %438 = vmatpush1.bf16.msra.mxu1 %v1028_v44  ;;  %v1062_v44 = vld [vmem:[#allocation8 + $0x8] sm:$0xff]  }
 0x15d   :  { %439 = vmatprep.subr.bf16.mxu1 %v1033_v45  ;;  %v1063_v45 = vld [vmem:[#allocation8 + $0x10] sm:$0xff]  }
 0x160   :  { %440 = vmatpush1.bf16.msra.mxu1 %v1031_v46  ;;  %v1064_v46 = vld [vmem:[#allocation8 + $0x18] sm:$0xff]  }
 0x161   :  { %441 = vmatprep.subr.bf16.mxu1 %v1036_v47  ;;  %v1065_v47 = vld [vmem:[#allocation8 + $0x20] sm:$0xff]  }
 0x164   :  { %442 = vmatpush1.bf16.msra.mxu1 %v1034_v48  ;;  %v1067_v48 = vld [vmem:[#allocation8 + $0x30] sm:$0xff]  }
 0x165   :  { %942 = vmatprep.subr.bf16.mxu1 %v1200_v18 }
 0x21a   :  { %v298_v50 = vpop.f32.mrb[0].mxu1 }
 0x21b   :  { %v315_v51 = vmul.f32 %v1360_v49, %v298_v50  ;;  %v940_v52 = vpop.f32.mrb[1].mxu1  ;;  %v1068_v50 = vld [vmem:[#allocation8 + $0x38] sm:$0xff]  }
 0x21c   :  { %v301_v55 = vpop.f32.mrb[2].mxu1 }
 0x21d   :  { %v317_v56 = vadd.f32 %v315_v51, %v247_v28  ;;  %v316_v57 = vmul.f32 %v1363_v53, %v301_v55  ;;  %v941_v58 = vpop.f32.mrb[3].mxu1 }
 0x21f   :  { %v326_v59 = vadd.f32 %v875_v54, %v317_v56  ;;  %v318_v60 = vadd.f32 %v316_v57, %v251_v32 }
 0x221   :  { %v327_v61 = vadd.f32 %v875_v54, %v318_v60  ;;  %v328_v62 = vmax.f32 %v326_v59, 0.0  ;;  %v911_v59 = vld [vmem:[%s1422_s8] ss:$0 sm:$0xff]  ;;  %s1161_s8 = scalar_lea.vmem %s843_s5, 256 }
 0x222   :  { %p1162_p4 = scmp.ne.s32.totalorder %s843_s5, %s1161_s8  ;;  %p1167_p6 = scmp.lt.s32.totalorder %s1161_s8, %s1161_s8 }
 0x223   :  { %v329_v63 = vmax.f32 %v327_v61, 0.0 }
 0x224   :  { %p1168_p7 = por %p1167_p6, %p1166_p5 }
 0x225   :  { %v330_v1 = vpack.c.bf16 %v329_v63, %v328_v62 }
 0x226   :  { %p1169_p8 = pnand %p1168_p7, %p1162_p4 }
 0x227   :  { %460 = vmatmul.mubr.bf16.vlgmr.msra.gmra.mrb[4].mxu1 %v330_v1 }
 0x228   :  { %944 = vmatprep.mubr.msk.bf16.mxu1 %vm1201_vm0, %v1200_v18 }
 0x2fa   :  { %v461_v2 = vpop.f32.mrb[4].mxu1 }
 0x2fb   :  { %v463_v3 = vpop.f32.mrb[5].mxu1 }
 0x2fc   :  { %v465_v4 = vpop.f32.mrb[6].mxu1 }
 0x2fd   :  { %v470_v6 = vpack.c.bf16 %v465_v4, %v461_v2  ;;  %v467_v7 = vpop.f32.mrb[7].mxu1 }
 0x2ff   :  { %943 = vmatpush3.bf16.msra.mxu1 %v470_v6 }
 0x300   :  { %624 = vmatprep.subr.bf16.mxu1 %v1039_v5 }
 0x302   :  { %945 = vmatmul.mubr.msk.bf16.vlgmr.msra.gmra.mrb[8].mxu1 %vm260_vm3, %v1354_v33 }
 0x303   :  { %625 = vmatpush1.bf16.msra.mxu1 %v1037_v8  ;;  %656 = vmatprep.mubr.bf16.mxu1 %v1199_v0  ;;  %v1055_v0 = vld [vmem:[#allocation7 + $0x60] ss:$8 sps:$4 sm:$0xff]  }
 0x304   :  { %626 = vmatprep.subr.bf16.mxu1 %v1042_v9 }
 0x307   :  { %627 = vmatpush1.bf16.msra.mxu1 %v1040_v10 }
 0x308   :  { %628 = vmatprep.subr.bf16.mxu1 %v1045_v11 }
 0x30b   :  { %629 = vmatpush1.bf16.msra.mxu1 %v1043_v12 }
 0x30c   :  { %630 = vmatprep.subr.bf16.mxu1 %v1048_v13 }
 0x30f   :  { %631 = vmatpush1.bf16.msra.mxu1 %v1046_v14 }
 0x310   :  { %632 = vmatprep.subr.bf16.mxu1 %v1051_v15 }
 0x313   :  { %633 = vmatpush1.bf16.msra.mxu1 %v1049_v16 }
 0x314   :  { %634 = vmatprep.subr.bf16.mxu1 %v1054_v17 }
 0x317   :  { %635 = vmatpush1.bf16.msra.mxu1 %v1052_v19 }
 0x318   :  { %636 = vmatprep.subr.bf16.mxu1 %v1057_v20 }
 0x31b   :  { %637 = vmatpush1.bf16.msra.mxu1 %v1055_v0 }
 0x31c   :  { %638 = vmatprep.subr.bf16.mxu1 %v1060_v21 }
 0x31f   :  { %639 = vmatpush1.bf16.msra.mxu1 %v1058_v22 }
 0x3d5   :  { %v505_v23 = vpop.f32.mrb[8].mxu1 }
 0x3d6   :  { %v512_v24 = vmul.f32 %v505_v23, %v1360_v49  ;;  %v946_v25 = vpop.f32.mrb[9].mxu1 }
 0x3d7   :  { %v508_v27 = vpop.f32.mrb[10].mxu1 }
 0x3d8   :  { %v514_v28 = vadd.f32 %v512_v24, %v463_v3  ;;  %v513_v29 = vmul.f32 %v508_v27, %v1363_v53  ;;  %v947_v30 = vpop.f32.mrb[11].mxu1 }
 0x3da   :  { %v523_v31 = vadd.f32 %v893_v26, %v514_v28  ;;  %v515_v32 = vadd.f32 %v513_v29, %v467_v7 }
 0x3dc   :  { %v524_v34 = vadd.f32 %v893_v26, %v515_v32  ;;  %v525_v35 = vmax.f32 %v523_v31, 0.0 }
 0x3de   :  { %v526_v36 = vmax.f32 %v524_v34, 0.0 }
 0x3e0   :  { %v527_v37 = vpack.c.bf16 %v526_v36, %v525_v35 }
 0x3e2   :  { %657 = vmatmul.mubr.bf16.vlgmr.msra.gmra.mrb[12].mxu1 %v527_v37 }
 0x4b5   :  { %v658_v38 = vpop.f32.mrb[12].mxu1 }
 0x4b6   :  { %v660_v39 = vpop.f32.mrb[13].mxu1 }
 0x4b7   :  { %v662_v40 = vpop.f32.mrb[14].mxu1 }
 0x4b8   :  { %v667_v41 = vpack.c.bf16 %v662_v40, %v658_v38  ;;  %v664_v42 = vpop.f32.mrb[15].mxu1 }
 0x4ba   :  { %949 = vmatpush3.bf16.msra.mxu0 %v667_v41 }
 0x4bb   :  { %954 = vmatprep.subr.bf16.mxu0 %v1200_v18 }
 0x4bd   :  { %951 = vmatmul.mubr.msk.bf16.vlgmr.msra.gmra.mrb[4].mxu0 %vm260_vm3, %v1354_v33  ;;  %v1066_v33 = vld [vmem:[#allocation8 + $0x28] sm:$0xff]  }
 0x4be   :  { %955 = vmatpush3.bf16.msra.mxu0 %v1061_v43  ;;  %970 = vmatprep.mubr.msk.bf16.mxu0 %vm1201_vm0, %v1200_v18 }
 0x4bf   :  { %956 = vmatprep.subr.bf16.mxu0 %v1200_v18 }
 0x4c2   :  { %957 = vmatpush3.bf16.msra.mxu0 %v1062_v44 }
 0x4c3   :  { %958 = vmatprep.subr.bf16.mxu0 %v1200_v18 }
 0x4c6   :  { %959 = vmatpush3.bf16.msra.mxu0 %v1063_v45 }
 0x4c7   :  { %960 = vmatprep.subr.bf16.mxu0 %v1200_v18 }
 0x4ca   :  { %961 = vmatpush3.bf16.msra.mxu0 %v1064_v46 }
 0x4cb   :  { %962 = vmatprep.subr.bf16.mxu0 %v1200_v18 }
 0x4ce   :  { %963 = vmatpush3.bf16.msra.mxu0 %v1065_v47 }
 0x4cf   :  { %964 = vmatprep.subr.bf16.mxu0 %v1200_v18 }
 0x4d2   :  { %965 = vmatpush3.bf16.msra.mxu0 %v1066_v33 }
 0x4d3   :  { %966 = vmatprep.subr.bf16.mxu0 %v1200_v18 }
 0x4d6   :  { %967 = vmatpush3.bf16.msra.mxu0 %v1067_v48 }
 0x4d7   :  { %968 = vmatprep.subr.bf16.mxu0 %v1200_v18  ;;  %v912_v18 = vld [vmem:[%s1424_s10] ss:$0 sm:$0xff] }
 0x4da   :  { %969 = vmatpush3.bf16.msra.mxu0 %v1068_v50 }
 0x590   :  { %v702_v51 = vpop.f32.mrb[4].mxu0 }
 0x591   :  { %v709_v52 = vmul.f32 %v702_v51, %v1360_v49  ;;  %v952_v54 = vpop.f32.mrb[5].mxu0 }
 0x592   :  { %v705_v55 = vpop.f32.mrb[6].mxu0 }
 0x593   :  { %v711_v56 = vadd.f32 %v709_v52, %v660_v39  ;;  %v710_v57 = vmul.f32 %v705_v55, %v1363_v53  ;;  %v953_v58 = vpop.f32.mrb[7].mxu0 }
 0x595   :  { %v712_v60 = vadd.f32 %v710_v57, %v664_v42  ;;  %v720_v61 = vadd.f32 %v911_v59, %v711_v56 }
 0x597   :  { %v721_v62 = vadd.f32 %v911_v59, %v712_v60 }
 0x599   :  { %v722_v63 = vpack.c.bf16 %v721_v62, %v720_v61 }
 0x59b   :  { %971 = vmatmul.mubr.bf16.vlgmr.msra.gmra.mrb[8].mxu0 %v722_v63 }
 0x66e   :  { %v828_v49 = vpop.f32.mrb[8].mxu0 }
 0x66f   :  { %v829_v1 = vadd.f32 %v912_v18, %v828_v49  ;;  %v972_v2 = vpop.f32.mrb[9].mxu0 }
 0x670   :  { %v831_v53 = vpop.f32.mrb[10].mxu0 }
 0x671   :  { %835 = vst [vmem:[#allocation10] sm:$0xff] %v829_v1  ;;  %v832_v3 = vadd.f32 %v912_v18, %v831_v53  ;;  %v973_v4 = vpop.f32.mrb[11].mxu0 }
 0x673   :  { %836 = vst [vmem:[#allocation10 + $0x8] sm:$0xff] %v832_v3 }
 0x674   :  { %1172 = shalt.err (!%p1169_p8)
}
 0x675   :  { %s1173_s24 = scalar_lea.hbm %s1425_s11, 256 }
 0x676   :  { %p1174_p9 = scmp.ne.s32.totalorder %s1425_s11, %s1173_s24  ;;  %p1177_p10 = scmp.lt.u32.totalorder %s1173_s24, %s1425_s11 }
 0x678   :  { %p1179_p11 = pnand %p1177_p10, %p1174_p9 }
 0x67a   :  { %1182 = shalt.err (!%p1179_p11)
}
 0x67b   :  { %848 = dma.vmem_to_hbm [thread:$0]  %s843_s5, 256, %s1425_s11, [#allocation4], %s1193_s29, %s1193_s29, %s1194_s30  }
 0x67c   :  { %1189 = dma.done.wait [#allocation4], 256  }
 0x67d   :  { %1190 = vsyncadd [#allocation4], 4294967040 }
 0x67e   :  { %852 = vsyncpa [#allocation3], 1 }
 0x67f   :  { %853 = vsyncpa [#allocation6], 1 }
 0x680   :  { %854 = vsyncpa [#allocation9], 1 }
 0x681   :  { %855 = vsyncpa [#allocation4], 1 }

</bundles_post_ra>
